<compile_context>
chip_gen: v7x
topology: tpu7x:2x2x1
jax: 0.10.0
libtpu: 0.0.40
codegen_flags: <defaults>
</compile_context>

<pallas_src>
import functools

import jax
import jax.numpy as jnp
import numpy as np
from jax.experimental import pallas as pl
from jax.experimental.pallas import tpu as pltpu


def greedy_ctc_kernel(em_ref, prev_ref, out_ref, *, blank, tile_t, total_t):
    """Per-timestep argmax + fused CTC keep-mask, one time-tile per grid step.

    out_ref[0, 0, t] = argmax_l emission[global_t, l]  if the timestep starts a
                       new run AND is not `blank` AND is not padding,
                       else -1 (dropped).
    """
    i = pl.program_id(0)

    em = em_ref[...]                                                  # (TILE_T, L) f32
    # argmax over labels, relaid to a lane-dense (1, TILE_T) row vector.
    idx = jnp.argmax(em, axis=-1).astype(jnp.int32)[None, :]          # (1, TILE_T)

    # Previous timestep's argmax within the tile (lane rotate; the wrapped
    # element at local_t == 0 is overridden below).
    prev_in_tile = pltpu.roll(idx, shift=1, axis=1)                   # (1, TILE_T)

    # Argmax of the last row of the PREVIOUS tile (global row i*TILE_T - 1),
    # read from the overlapping (8, L) block; row 7 is exactly that row.
    # For i == 0 it is garbage but masked by the global_t == 0 condition.
    prev_boundary = jnp.argmax(prev_ref[7, :]).astype(jnp.int32)      # scalar

    local_t = jax.lax.broadcasted_iota(jnp.int32, (1, tile_t), 1)     # (1, TILE_T)
    global_t = local_t + i * tile_t

    prev = jnp.where(local_t == 0, prev_boundary, prev_in_tile)
    is_new_run = jnp.logical_or(global_t == 0, idx != prev)
    keep = jnp.logical_and(is_new_run, idx != blank)
    keep = jnp.logical_and(keep, global_t < total_t)                  # mask pad rows

    fused = jnp.where(keep, idx, -1)                                  # -1 == dropped
    out_ref[...] = fused[:, None, :].astype(out_ref.dtype)            # (1, 1, TILE_T)


def greedy_ctc_decode_arrays(emission, blank=0, tile_t=None):
    """Run the Pallas kernel.

    Returns a (T,) array: argmax index where the timestep is kept by the CTC
    collapse (new run, not blank), -1 where it is dropped.
    """
    T, L = emission.shape
    itemsize = jnp.dtype(emission.dtype).itemsize

    if tile_t is None:
        # Lane-dense tile (multiple of 128), capped so a double-buffered input
        # block stays well under VMEM on every generation (v7x: 64 MiB total).
        budget = 4 * 1024 * 1024
        tile_t = max(128, min(2048, (budget // (L * itemsize)) // 128 * 128))
    assert tile_t % 128 == 0

    num_tiles = pl.cdiv(T, tile_t)
    t_pad = num_tiles * tile_t
    if t_pad != T:
        emission = jnp.pad(emission, ((0, t_pad - T), (0, 0)))

    # Narrow output dtype: 4x less HBM writeback / D2H than int32 when possible.
    if L <= 127:
        out_dtype = jnp.int8
    elif L <= 32767:
        out_dtype = jnp.int16
    else:
        out_dtype = jnp.int32

    kernel = functools.partial(
        greedy_ctc_kernel, blank=blank, tile_t=tile_t, total_t=T)

    fused = pl.pallas_call(
        kernel,
        out_shape=jax.ShapeDtypeStruct((num_tiles, 1, tile_t), out_dtype),
        grid=(num_tiles,),
        in_specs=[
            # Main time-tile of the emission matrix.
            pl.BlockSpec((tile_t, L), lambda i: (i, 0)),
            # Overlapping 8-row window whose last row is global row i*TILE_T-1
            # (the previous tile's last timestep).  No cross-iteration carry,
            # so the grid axis stays "parallel".
            pl.BlockSpec(
                (8, L),
                lambda i: (jnp.maximum(i * (tile_t // 8) - 1, 0), 0)),
        ],
        out_specs=pl.BlockSpec((1, 1, tile_t), lambda i: (i, 0, 0)),
        compiler_params=pltpu.CompilerParams(
            dimension_semantics=("parallel",)),
    )(emission, emission)

    return fused.reshape(-1)[:T]


@jax.jit
def _compact_kept(fused):
    """Device-side compaction: kept indices first (original order), plus count."""
    keep = fused >= 0
    order = jnp.argsort(jnp.logical_not(keep).astype(jnp.int32), stable=True)
    return jnp.take(fused, order), jnp.sum(keep, dtype=jnp.int32)


def greedy_ctc_decode(emission, labels, blank=0, tile_t=None):
    """Full decoder: kernel + device-side compaction + host-side string join."""
    fused = greedy_ctc_decode_arrays(emission, blank=blank, tile_t=tile_t)
    compact, count = _compact_kept(fused)
    # TODO(synk): a truly variable-length D2H transfer + str join has no Pallas
    # equivalent; only the label lookup / join stays in Python.
    compact = jax.device_get(compact)
    count = int(jax.device_get(count))
    return ''.join(labels[int(i)] for i in compact[:count])


def _reference_decode(emission, labels, blank=0):
    """Pure-numpy reference matching torch semantics."""
    em = np.asarray(emission)
    idx = em.argmax(axis=-1)
    out = []
    prev = None
    for i in idx:
        if i != prev:
            out.append(int(i))
        prev = i
    return ''.join(labels[i] for i in out if i != blank)


if __name__ == "__main__":
    # Small deterministic setup; T=300 with tile_t=128 exercises multiple time
    # tiles, the tile-boundary carry, and the padded final tile.
    NUM_SEQ, NUM_LABEL = 300, 32
    labels = ['-'] + list("abcdefghijklmnopqrstuvwxyz") + [' ', "'", '.', ',', '|']
    assert len(labels) == NUM_LABEL

    key = jax.random.PRNGKey(0)
    emission = jax.random.normal(key, (NUM_SEQ, NUM_LABEL), dtype=jnp.float32)

    fused = greedy_ctc_decode_arrays(emission, blank=0, tile_t=128)
    jax.block_until_ready(fused)

    # Check the fused kernel output against numpy.
    em_np = np.asarray(emission)
    idx_np = em_np.argmax(axis=-1)
    keep_np = np.ones_like(idx_np, dtype=bool)
    keep_np[1:] = idx_np[1:] != idx_np[:-1]
    keep_np &= idx_np != 0
    fused_np = np.where(keep_np, idx_np, -1).astype(np.asarray(fused).dtype)
    assert np.array_equal(np.asarray(fused), fused_np), "fused mask mismatch"

    # Check the end-to-end transcript against the torch-semantics reference.
    transcript = greedy_ctc_decode(emission, labels, blank=0, tile_t=128)
    expected = _reference_decode(emission, labels, blank=0)
    assert transcript == expected, (transcript, expected)

    print("KERNEL_OK")
</pallas_src>

<mosaic_0001>
module attributes {stable_mosaic.version = 11 : i64} {
  func.func @greedy_ctc_kernel(%arg0: i32, %arg1: memref<128x32xf32, #tpu.memory_space<vmem>>, %arg2: memref<8x32xf32, #tpu.memory_space<vmem>>, %arg3: memref<1x1x128xi8, #tpu.memory_space<vmem>>) attributes {dimension_semantics = [#tpu.dimension_semantics<parallel>], iteration_bounds = array<i64: 3>, scalar_prefetch = 0 : i64, scratch_operands = 0 : i64, tpu.core_type = #tpu.core_type<tc>, window_params = [{transform_indices = @transform_0, window_bounds = array<i64: 128, 32>}, {transform_indices = @transform_1, window_bounds = array<i64: 8, 32>}, {transform_indices = @transform_2, window_bounds = array<i64: 1, 1, 128>}]} {
    %c0 = arith.constant 0 : index
    %c0_0 = arith.constant 0 : index
    %0 = vector.load %arg1[%c0, %c0_0] : memref<128x32xf32, #tpu.memory_space<vmem>>, vector<128x32xf32>
    %1 = tpu.reduce_index %0 {axis = 1 : i32, kind = #tpu.reduction_kind<arg_max>} : vector<128x32xf32> -> vector<128xi32>
    %2 = vector.shape_cast %1 : vector<128xi32> to vector<1x128xi32>
    %c1_i32 = arith.constant 1 : i32
    %3 = tpu.dynamic_rotate %2 by %c1_i32 dim 1 : vector<1x128xi32>, i32 -> vector<1x128xi32>
    %c7 = arith.constant 7 : index
    %c0_1 = arith.constant 0 : index
    %4 = vector.load %arg2[%c7, %c0_1] : memref<8x32xf32, #tpu.memory_space<vmem>>, vector<1x32xf32>
    %5 = vector.shape_cast %4 : vector<1x32xf32> to vector<32xf32>
    %6 = vector.shape_cast %5 : vector<32xf32> to vector<1x32xf32>
    %7 = tpu.reduce_index %6 {axis = 1 : i32, kind = #tpu.reduction_kind<arg_max>} : vector<1x32xf32> -> vector<1xi32>
    %8 = vector.extract %7[0] : i32 from vector<1xi32>
    %9 = tpu.iota {dimensions = array<i32: 1>} : vector<1x128xi32>
    %c128_i32 = arith.constant 128 : i32
    %10 = arith.muli %arg0, %c128_i32 : i32
    %11 = vector.broadcast %10 : i32 to vector<1x128xi32>
    %12 = arith.addi %9, %11 : vector<1x128xi32>
    %c0_i32 = arith.constant 0 : i32
    %13 = vector.broadcast %c0_i32 : i32 to vector<1x128xi32>
    %14 = arith.cmpi eq, %9, %13 : vector<1x128xi32>
    %15 = vector.broadcast %8 : i32 to vector<1x128xi32>
    %16 = arith.select %14, %15, %3 : vector<1x128xi1>, vector<1x128xi32>
    %c0_i32_2 = arith.constant 0 : i32
    %17 = vector.broadcast %c0_i32_2 : i32 to vector<1x128xi32>
    %18 = arith.cmpi eq, %12, %17 : vector<1x128xi32>
    %19 = arith.cmpi ne, %2, %16 : vector<1x128xi32>
    %20 = arith.ori %18, %19 : vector<1x128xi1>
    %c0_i32_3 = arith.constant 0 : i32
    %21 = vector.broadcast %c0_i32_3 : i32 to vector<1x128xi32>
    %22 = arith.cmpi ne, %2, %21 : vector<1x128xi32>
    %23 = arith.andi %20, %22 : vector<1x128xi1>
    %c300_i32 = arith.constant 300 : i32
    %24 = vector.broadcast %c300_i32 : i32 to vector<1x128xi32>
    %25 = arith.cmpi slt, %12, %24 : vector<1x128xi32>
    %26 = arith.andi %23, %25 : vector<1x128xi1>
    %c-1_i32 = arith.constant -1 : i32
    %27 = vector.broadcast %c-1_i32 : i32 to vector<1x128xi32>
    %28 = arith.select %26, %2, %27 : vector<1x128xi1>, vector<1x128xi32>
    %29 = vector.shape_cast %28 : vector<1x128xi32> to vector<1x1x128xi32>
    %30 = arith.trunci %29 : vector<1x1x128xi32> to vector<1x1x128xi8>
    %c0_4 = arith.constant 0 : index
    %c0_5 = arith.constant 0 : index
    %c0_6 = arith.constant 0 : index
    %31 = vector.load %arg3[%c0_4, %c0_5, %c0_6] : memref<1x1x128xi8, #tpu.memory_space<vmem>>, vector<1x1x128xi8>
    tpu.vector_store %arg3[%c0_4, %c0_5, %c0_6], %30 {strides = array<i32>} : memref<1x1x128xi8, #tpu.memory_space<vmem>>, vector<1x1x128xi8>,
    return
  }
  func.func @transform_0(%arg0: i32) -> (i32, i32) {
    %c0_i32 = arith.constant 0 : i32
    %c0_i32_0 = arith.constant 0 : i32
    return %arg0, %c0_i32 : i32, i32
  }
  func.func @transform_1(%arg0: i32) -> (i32, i32) {
    %c16_i32 = arith.constant 16 : i32
    %0 = arith.muli %arg0, %c16_i32 : i32
    %c1_i32 = arith.constant 1 : i32
    %1 = arith.subi %0, %c1_i32 : i32
    %c0_i32 = arith.constant 0 : i32
    %2 = arith.maxsi %1, %c0_i32 : i32
    %c0_i32_0 = arith.constant 0 : i32
    %c0_i32_1 = arith.constant 0 : i32
    return %2, %c0_i32_0 : i32, i32
  }
  func.func @transform_2(%arg0: i32) -> (i32, i32, i32) {
    %c0_i32 = arith.constant 0 : i32
    %c0_i32_0 = arith.constant 0 : i32
    %c0_i32_1 = arith.constant 0 : i32
    return %arg0, %c0_i32, %c0_i32_0 : i32, i32, i32
  }
}

</mosaic_0001>

<bundles_post_ra>
// kernel: tpu_custom_call.1
= control target key start
LH: loop header
LB: loop body
LE: loop exit
PB: predicated region body
PF: predicated region fallthrough
CT: control target
= control target key end

     0   :  { %s854_s9 = smov 0   ;;  %s1196_s0 = inlined_call_operand.vmem [shape: f32[384,32], index: 0, kind: input, shape index: {}]   ;;  %s1197_s1 = inlined_call_operand.vmem [shape: f32[384,32], index: 1, kind: input, shape index: {}]   ;;  %s1198_s2 = inlined_call_operand.vmem [shape: s8[3,1,128], index: 2, kind: output, shape index: {}]  }
   0x1 LB: > { %s860_s10 = sadd.s32 4294967295, %s835_s9   ;;  %p797_p0 = scmp.ge.s32.totalorder %s835_s9, 1  ;;  %s835_s9 = sphi %s854_s9, %s12_s9  }
   0x2   : > { %p138_p1 = scmp.lt.s32.totalorder %s835_s9, 4 }
   0x4   : > { %p139_p2 = pnand %p797_p0, %p138_p1 }
   0x5   : > { %s798_s11 = sshll.u32 (!%p139_p2), %s860_s10, 4  ;;  %v837_v0 = vmov (!%p139_p2), 0   ;;  %vm203_vm0 = vcmask (!%p139_p2), 261120   ;;  %vm366_vm1 = vcmask (!%p139_p2), 253952   ;;  %v252_v35 = vlaneseq (!%p139_p2)  ;;  %s838_s22 = smov (!%p139_p2), 1  }
   0x6   : > { %142 = sbr.rel (%p139_p2) target bundleno = 602 (0x25a), region = 28  ;;  %p167_p3 = scmp.lt.s32.totalorder (!%p139_p2), %s798_s11, 47  ;;  %828 = vset.pattern.permute.xlu1 (!%p139_p2), %v837_v0  ;;  %827 = vset.pattern.permute.xlu0 (!%p139_p2), %v837_v0  ;;  %vm263_vm2 = vcmask (!%p139_p2), 130112   ;;  %vm270_vm3 = vcmask (!%p139_p2), 195712   ;;  %vm277_vm4 = vcmask (!%p139_p2), 261312   ;;  %vm284_vm5 = vcmask (!%p139_p2), 326912  }
   0x7   : > { %s801_s17 = sadd.s32 (!%p139_p2), 4294967295, %s798_s11  ;;  %v907_v36 = vand.u32 (!%p139_p2), 127, %v252_v35  ;;  %v909_v37 = vshrl.u32 (!%p139_p2), %v252_v35, 7  ;;  %vm291_vm6 = vcmask (!%p139_p2), 392512   ;;  %vm298_vm7 = vcmask (!%p139_p2), 458112   ;;  %s808_s24 = sshll.u32 (!%p139_p2), %s860_s10, 7 }
   0x8   : > { %p174_p4 = scmp.gt.s32.totalorder (!%p139_p2), %s801_s17, 0  ;;  %p802_p5 = scmp.lt.s32.totalorder (!%p139_p2), %s801_s17, 47  ;;  %vm305_vm8 = vcmask (!%p139_p2), 523712   ;;  %vm312_vm9 = vcmask (!%p139_p2), 589312   ;;  %vm319_vm10 = vcmask (!%p139_p2), 654912   ;;  %vm326_vm11 = vcmask (!%p139_p2), 720512  }
   0x9   : > { %v258_v38 = vadd.s32 (!%p139_p2), 4294967288, %v907_v36  ;;  %v272_v39 = vadd.s32 (!%p139_p2), 4294967272, %v907_v36  ;;  %v265_v40 = vadd.s32 (!%p139_p2), 4294967280, %v907_v36  ;;  %v279_v43 = vadd.s32 (!%p139_p2), 4294967264, %v907_v36  ;;  %p184_p6 = scmp.lt.s32.totalorder (!%p139_p2), %s860_s10, 2 }
   0xa   : > { %v921_v44 = vsub.s32 (!%p139_p2), %v907_v36, %v909_v37  ;;  %v286_v48 = vadd.s32 (!%p139_p2), 4294967256, %v907_v36  ;;  %v293_v55 = vadd.s32 (!%p139_p2), 4294967248, %v907_v36  ;;  %v300_v58 = vadd.s32 (!%p139_p2), 4294967240, %v907_v36 }
   0xb   : > { %v924_v45 = vsub.s32 (!%p139_p2), %v258_v38, %v909_v37  ;;  %v927_v46 = vsub.s32 (!%p139_p2), %v272_v39, %v909_v37  ;;  %v930_v47 = vsub.s32 (!%p139_p2), %v265_v40, %v909_v37  ;;  %v938_v51 = vsub.s32 (!%p139_p2), %v279_v43, %v909_v37 }
   0xc   : > { %v950_v57 = vsub.s32 (!%p139_p2), %v286_v48, %v909_v37  ;;  %vm333_vm12 = vcmask (!%p139_p2), 786112   ;;  %vm1202_vm13 = vcmask (!%p139_p2), 851712   ;;  %vm1201_vm14 = vcmask (!%p139_p2), 917312  }
   0xd   : > { %s168_s12 = scalar_select %p167_p3, %s798_s11, 47  ;;  %vm1200_vm15 = vcmask 982912  }
   0xe   : > { %s1212_s17 = smov (!%p174_p4, %s801_s17), 0  ;;  %s1216_s10 = smov (!%p184_p6, %s860_s10), 2 }
   0xf   : > { %s799_s13 = sshll.u32 %s168_s12, 3  ;;  %s1214_s17 = smov (!%p802_p5, %s1212_s17), 47 }
  0x10   : > { %s870_s16 = scalar_lea.vmem %s1196_s0, %s799_s13  ;;  %s807_s18 = sshll.u32 %s1214_s17, 3 }
  0x11   : > { %v187_v1 = vld [vmem:[%s870_s16] sm:$0xff]  ;;  %v189_v2 = vld [vmem:[%s870_s16 + $0x10] sm:$0xff]  ;;  %v188_v3 = vld [vmem:[%s870_s16 + $0x8] sm:$0xff]  ;;  %s179_s21 = scalar_lea.vmem %s1197_s1, %s807_s18  ;;  %s186_s27 = scalar_lea.vmem %s1198_s2, %s1216_s10 }
  0x12   : > { %v204_v4 = vsel %vm203_vm0, %v187_v1, -inf  ;;  %v210_v5 = vsel %vm203_vm0, %v189_v2, -inf  ;;  %v190_v6 = vld [vmem:[%s870_s16 + $0x18] sm:$0xff]  ;;  %v207_v7 = vsel %vm203_vm0, %v188_v3, -inf  ;;  %v191_v9 = vld [vmem:[%s870_s16 + $0x20] sm:$0xff]  ;;  %v192_v10 = vld [vmem:[%s870_s16 + $0x28] sm:$0xff]  ;;  %v963_v2 = vsub.s32 %v293_v55, %v909_v37 }
  0x13   : > { %205 = vmax.index.xlane.f32.xlu0 %v204_v4  ;;  %211 = vmax.index.xlane.f32.xlu1 %v210_v5  ;;  %v213_v8 = vsel %vm203_vm0, %v190_v6, -inf  ;;  %v216_v11 = vsel %vm203_vm0, %v191_v9, -inf  ;;  %v219_v12 = vsel %vm203_vm0, %v192_v10, -inf  ;;  %v193_v13 = vld [vmem:[%s870_s16 + $0x30] sm:$0xff]  ;;  %v194_v14 = vld [vmem:[%s870_s16 + $0x38] sm:$0xff]  ;;  %v195_v17 = vld [vmem:[%s870_s16 + $0x40] sm:$0xff]  ;;  %v969_v5 = vsub.s32 %v300_v58, %v909_v37 }
  0x14   : > { %v222_v15 = vsel %vm203_vm0, %v193_v13, -inf  ;;  %v225_v16 = vsel %vm203_vm0, %v194_v14, -inf  ;;  %v196_v18 = vld [vmem:[%s870_s16 + $0x48] sm:$0xff]  ;;  %v228_v19 = vsel %vm203_vm0, %v195_v17, -inf  ;;  %v197_v21 = vld [vmem:[%s870_s16 + $0x50] sm:$0xff]  ;;  %v198_v22 = vld [vmem:[%s870_s16 + $0x58] sm:$0xff] }
  0x15   : > { %v231_v20 = vsel %vm203_vm0, %v196_v18, -inf  ;;  %v234_v23 = vsel %vm203_vm0, %v197_v21, -inf  ;;  %v237_v24 = vsel %vm203_vm0, %v198_v22, -inf  ;;  %v199_v25 = vld [vmem:[%s870_s16 + $0x60] sm:$0xff]  ;;  %v200_v26 = vld [vmem:[%s870_s16 + $0x68] sm:$0xff]  ;;  %v201_v29 = vld [vmem:[%s870_s16 + $0x70] sm:$0xff] }
  0x16   : > { %v240_v27 = vsel %vm203_vm0, %v199_v25, -inf  ;;  %v243_v28 = vsel %vm203_vm0, %v200_v26, -inf  ;;  %v202_v30 = vld [vmem:[%s870_s16 + $0x78] sm:$0xff]  ;;  %v246_v31 = vsel %vm203_vm0, %v201_v29, -inf  ;;  %v365_v33 = vld [vmem:[%s179_s21 + $0x7] sm:$0x1] }
  0x17   : > { %208 = vmax.index.xlane.f32.xlu0 %v207_v7  ;;  %214 = vmax.index.xlane.f32.xlu1 %v213_v8  ;;  %v249_v32 = vsel %vm203_vm0, %v202_v30, -inf  ;;  %v367_v34 = vsel %vm366_vm1, %v365_v33, -inf  ;;  %v307_v3 = vadd.s32 4294967232, %v907_v36  ;;  %v314_v6 = vadd.s32 4294967224, %v907_v36 }
  0x18   : > { %v335_v22 = vadd.s32 4294967200, %v907_v36  ;;  %v342_v26 = vadd.s32 4294967192, %v907_v36  ;;  %v356_v33 = vadd.s32 4294967176, %v907_v36  ;;  %vm1199_vm0 = vcmask 1048512  }
  0x19   : > { %vm374_vm1 = vcmp.eq.s32.totalorder %v907_v36, 0 }
  0x1a   : > { %v1024_v38 = vsub.s32 %v342_v26, %v909_v37 }
  0x1b   : > { %217 = vmax.index.xlane.f32.xlu0 %v216_v11  ;;  %220 = vmax.index.xlane.f32.xlu1 %v219_v12  ;;  %v980_v11 = vsub.s32 %v307_v3, %v909_v37  ;;  %v321_v12 = vadd.s32 4294967216, %v907_v36 }
  0x1d   : > { %v998_v21 = vsub.s32 %v321_v12, %v909_v37 }
  0x1f   : > { %223 = vmax.index.xlane.f32.xlu0 %v222_v15  ;;  %226 = vmax.index.xlane.f32.xlu1 %v225_v16  ;;  %v987_v15 = vsub.s32 %v314_v6, %v909_v37  ;;  %v328_v16 = vadd.s32 4294967208, %v907_v36 }
  0x21   : > { %v1005_v25 = vsub.s32 %v328_v16, %v909_v37 }
  0x23   : > { %229 = vmax.index.xlane.f32.xlu0 %v228_v19  ;;  %232 = vmax.index.xlane.f32.xlu1 %v231_v20 }
  0x27   : > { %235 = vmax.index.xlane.f32.xlu0 %v234_v23  ;;  %238 = vmax.index.xlane.f32.xlu1 %v237_v24 }
  0x2b   : > { %241 = vmax.index.xlane.f32.xlu0 %v240_v27  ;;  %244 = vmax.index.xlane.f32.xlu1 %v243_v28 }
  0x2f   : > { %247 = vmax.index.xlane.f32.xlu0 %v246_v31  ;;  %250 = vmax.index.xlane.f32.xlu1 %v249_v32  ;;  %v1016_v31 = vsub.s32 %v335_v22, %v909_v37  ;;  %v349_v32 = vadd.s32 4294967184, %v907_v36 }
  0x33   : > { %368 = vmax.index.xlane.f32.xlu0 %v367_v34 }
  0xa0   : > { %v914_v41 = vpop.xlane.xlu0 %205  ;;  %v916_v42 = vpop.xlane.xlu1 %211 }
  0xa1   : > { %v257_v52 = vrot.slane %v914_v41, %v921_v44  ;;  %v269_v56 = vrot.slane %v916_v42, %v930_v47 }
  0xa4   : > { %v933_v49 = vpop.xlane.xlu0 %208  ;;  %v935_v50 = vpop.xlane.xlu1 %214 }
  0xa5   : > { %v262_v53 = vrot.slane %v933_v49, %v924_v45  ;;  %v276_v54 = vrot.slane %v935_v50, %v927_v46 }
  0xa7   : > { %v264_v59 = vsel %vm263_vm2, %v262_v53, %v257_v52  ;;  %v1034_v52 = vsub.s32 %v349_v32, %v909_v37  ;;  %v1037_v53 = vsub.s32 %v356_v33, %v909_v37 }
  0xa8   : > { %v271_v60 = vsel %vm270_vm3, %v269_v56, %v264_v59  ;;  %v955_v61 = vpop.xlane.xlu0 %217  ;;  %v957_v62 = vpop.xlane.xlu1 %220 }
  0xa9   : > { %v278_v63 = vsel %vm277_vm4, %v276_v54, %v271_v60  ;;  %v283_v1 = vrot.slane %v955_v61, %v938_v51  ;;  %v290_v4 = vrot.slane %v957_v62, %v950_v57 }
  0xab   : > { %v285_v7 = vsel %vm284_vm5, %v283_v1, %v278_v63 }
  0xac   : > { %v973_v8 = vpop.xlane.xlu0 %223  ;;  %v975_v9 = vpop.xlane.xlu1 %226  ;;  %v292_v13 = vsel %vm291_vm6, %v290_v4, %v285_v7 }
  0xad   : > { %v297_v10 = vrot.slane %v973_v8, %v963_v2  ;;  %v304_v14 = vrot.slane %v975_v9, %v969_v5 }
  0xaf   : > { %v299_v17 = vsel %vm298_vm7, %v297_v10, %v292_v13  ;;  %v380_v10 = vsub.s32 0, %v909_v37 }
  0xb0   : > { %v991_v18 = vpop.xlane.xlu0 %229  ;;  %v993_v19 = vpop.xlane.xlu1 %232  ;;  %v306_v23 = vsel %vm305_vm8, %v304_v14, %v299_v17 }
  0xb1   : > { %v311_v20 = vrot.slane %v991_v18, %v980_v11  ;;  %v318_v24 = vrot.slane %v993_v19, %v987_v15 }
  0xb3   : > { %v313_v27 = vsel %vm312_vm9, %v311_v20, %v306_v23 }
  0xb4   : > { %v1009_v28 = vpop.xlane.xlu0 %235  ;;  %v1011_v29 = vpop.xlane.xlu1 %238  ;;  %v320_v34 = vsel %vm319_vm10, %v318_v24, %v313_v27 }
  0xb5   : > { %v325_v30 = vrot.slane %v1009_v28, %v998_v21  ;;  %v332_v35 = vrot.slane %v1011_v29, %v1005_v25 }
  0xb7   : > { %v327_v39 = vsel %vm326_vm11, %v325_v30, %v320_v34 }
  0xb8   : > { %v1027_v40 = vpop.xlane.xlu0 %241  ;;  %v1029_v43 = vpop.xlane.xlu1 %244  ;;  %v334_v54 = vsel %vm333_vm12, %v332_v35, %v327_v39 }
  0xb9   : > { %v339_v48 = vrot.slane %v1027_v40, %v1016_v31  ;;  %v346_v55 = vrot.slane %v1029_v43, %v1024_v38 }
  0xbb   : > { %v341_v56 = vsel %vm1202_vm13, %v339_v48, %v334_v54 }
  0xbc   : > { %v1043_v58 = vpop.xlane.xlu0 %247  ;;  %v1045_v59 = vpop.xlane.xlu1 %250  ;;  %v348_v1 = vsel %vm1201_vm14, %v346_v55, %v341_v56 }
  0xbd   : > { %v353_v60 = vrot.slane %v1043_v58, %v1034_v52  ;;  %v360_v63 = vrot.slane %v1045_v59, %v1037_v53 }
  0xbf   : > { %v355_v3 = vsel %vm1200_vm15, %v353_v60, %v348_v1 }
  0xc0   : > { %v1054_v4 = vsel %vm1199_vm0, %v360_v63, %v355_v3  ;;  %v369_v6 = vpop.xlane.xlu0 %368 }
  0xc1   : > { %363 = vrot.lane.b32.xlu1 %v1054_v4, %s838_s22  ;;  %815 = vpush %v369_v6 }
  0xf2   : > { %s816_s23 = spop %815 }
  0xf3   : > { %v375_v7 = vstv %s816_s23 }
 0x133   : > { %v364_v12 = vpop.permute.xlu1 %363 }
 0x134   : > { %v376_v13 = vsel %vm374_vm1, %v375_v7, %v364_v12 }
 0x135   : > { %v381_v14 = vrot.slane %v376_v13, %v380_v10 }
 0x137   : > { %387 = vbcast.lane.b32.xlu1 %v381_v14, 264  ;;  %383 = vbcast.lane.b32.xlu0 %v381_v14, 256 }
 0x13b   : > { %391 = vbcast.lane.b32.xlu1 %v381_v14, 272  ;;  %399 = vbcast.lane.b32.xlu0 %v381_v14, 288 }
 0x13f   : > { %395 = vbcast.lane.b32.xlu1 %v381_v14, 280  ;;  %407 = vbcast.lane.b32.xlu0 %v381_v14, 304 }
 0x143   : > { %403 = vbcast.lane.b32.xlu1 %v381_v14, 296  ;;  %415 = vbcast.lane.b32.xlu0 %v381_v14, 320 }
 0x147   : > { %411 = vbcast.lane.b32.xlu1 %v381_v14, 312  ;;  %423 = vbcast.lane.b32.xlu0 %v381_v14, 336 }
 0x14b   : > { %419 = vbcast.lane.b32.xlu1 %v381_v14, 328  ;;  %431 = vbcast.lane.b32.xlu0 %v381_v14, 352 }
 0x14f   : > { %427 = vbcast.lane.b32.xlu1 %v381_v14, 344  ;;  %439 = vbcast.lane.b32.xlu0 %v381_v14, 368 }
 0x153   : > { %435 = vbcast.lane.b32.xlu1 %v381_v14, 360 }
 0x157   : > { %443 = vbcast.lane.b32.xlu1 %v381_v14, 376 }
 0x1a9   : > { %v388_v37 = vpop.permute.xlu1 %387  ;;  %v384_v16 = vpop.permute.xlu0 %383 }
 0x1aa   : > { %vm446_vm1 = vcmp.ne.s32.totalorder %v933_v49, %v388_v37  ;;  %vm445_vm0 = vcmp.ne.s32.totalorder %v914_v41, %v384_v16 }
 0x1ab   : > { %v462_v17 = vsel %vm446_vm1, 1, %v837_v0  ;;  %v461_v20 = vsel %vm445_vm0, 1, %v837_v0 }
 0x1ac   : > { %481 = vperm.xlu1 %828, %v462_v17   ;;  %478 = vperm.xlu0 %827, %v461_v20  }
 0x1ad   : > { %v392_v22 = vpop.permute.xlu1 %391  ;;  %v400_v23 = vpop.permute.xlu0 %399 }
 0x1ae   : > { %vm447_vm15 = vcmp.ne.s32.totalorder %v916_v42, %v392_v22  ;;  %vm449_vm14 = vcmp.ne.s32.totalorder %v955_v61, %v400_v23 }
 0x1af   : > { %v463_v24 = vsel %vm447_vm15, 1, %v837_v0  ;;  %v465_v30 = vsel %vm449_vm14, 1, %v837_v0 }
 0x1b0   : > { %484 = vperm.xlu1 %828, %v463_v24  }
 0x1b1   : > { %v396_v26 = vpop.permute.xlu1 %395  ;;  %v408_v27 = vpop.permute.xlu0 %407 }
 0x1b2   : > { %vm448_vm13 = vcmp.ne.s32.totalorder %v935_v50, %v396_v26  ;;  %vm451_vm0 = vcmp.ne.s32.totalorder %v973_v8, %v408_v27 }
 0x1b3   : > { %v464_v32 = vsel %vm448_vm13, 1, %v837_v0  ;;  %v467_v35 = vsel %vm451_vm0, 1, %v837_v0 }
 0x1b4   : > { %487 = vperm.xlu0 %827, %v464_v32   ;;  %490 = vperm.xlu1 %828, %v465_v30  }
 0x1b5   : > { %v404_v33 = vpop.permute.xlu1 %403  ;;  %v416_v34 = vpop.permute.xlu0 %415 }
 0x1b6   : > { %vm450_vm1 = vcmp.ne.s32.totalorder %v957_v62, %v404_v33  ;;  %vm453_vm15 = vcmp.ne.s32.totalorder %v991_v18, %v416_v34 }
 0x1b7   : > { %v466_v39 = vsel %vm450_vm1, 1, %v837_v0  ;;  %v469_v55 = vsel %vm453_vm15, 1, %v837_v0 }
 0x1b8   : > { %493 = vperm.xlu0 %827, %v466_v39   ;;  %496 = vperm.xlu1 %828, %v467_v35  }
 0x1b9   : > { %v412_v48 = vpop.permute.xlu1 %411  ;;  %v424_v54 = vpop.permute.xlu0 %423 }
 0x1ba   : > { %vm452_vm13 = vcmp.ne.s32.totalorder %v975_v9, %v412_v48  ;;  %vm455_vm14 = vcmp.ne.s32.totalorder %v1009_v28, %v424_v54 }
 0x1bb   : > { %v468_v56 = vsel %vm452_vm13, 1, %v837_v0  ;;  %v471_v1 = vsel %vm455_vm14, 1, %v837_v0 }
 0x1bc   : > { %499 = vperm.xlu0 %827, %v468_v56   ;;  %502 = vperm.xlu1 %828, %v469_v55  }
 0x1bd   : > { %v420_v60 = vpop.permute.xlu1 %419  ;;  %v432_v63 = vpop.permute.xlu0 %431 }
 0x1be   : > { %vm454_vm0 = vcmp.ne.s32.totalorder %v993_v19, %v420_v60  ;;  %vm457_vm1 = vcmp.ne.s32.totalorder %v1027_v40, %v432_v63 }
 0x1bf   : > { %v470_v3 = vsel %vm454_vm0, 1, %v837_v0  ;;  %v473_v10 = vsel %vm457_vm1, 1, %v837_v0  ;;  %vm607_vm1 = vcmp.ne.s32.totalorder %v933_v49, 0 }
 0x1c0   : > { %505 = vperm.xlu0 %827, %v470_v3   ;;  %508 = vperm.xlu1 %828, %v471_v1   ;;  %v623_v20 = vsel %vm607_vm1, 1, %v837_v0  ;;  %vm611_vm1 = vcmp.ne.s32.totalorder %v957_v62, 0 }
 0x1c1   : > { %v428_v6 = vpop.permute.xlu1 %427  ;;  %v440_v7 = vpop.permute.xlu0 %439  ;;  %v645_v23 = vrot.slane %v623_v20, %v924_v45  ;;  %v627_v39 = vsel %vm611_vm1, 1, %v837_v0  ;;  %vm616_vm1 = vcmp.ne.s32.totalorder %v1009_v28, 0 }
 0x1c2   : > { %vm456_vm15 = vcmp.ne.s32.totalorder %v1011_v29, %v428_v6  ;;  %vm459_vm13 = vcmp.ne.s32.totalorder %v1043_v58, %v440_v7  ;;  %v665_v56 = vrot.slane %v627_v39, %v950_v57 }
 0x1c3   : > { %v472_v12 = vsel %vm456_vm15, 1, %v837_v0  ;;  %v475_v14 = vsel %vm459_vm13, 1, %v837_v0  ;;  %vm606_vm15 = vcmp.ne.s32.totalorder %v914_v41, 0  ;;  %vm608_vm13 = vcmp.ne.s32.totalorder %v916_v42, 0 }
 0x1c4   : > { %511 = vperm.xlu0 %827, %v472_v12   ;;  %514 = vperm.xlu1 %828, %v473_v10   ;;  %v622_v22 = vsel %vm606_vm15, 1, %v837_v0  ;;  %v624_v26 = vsel %vm608_vm13, 1, %v837_v0  ;;  %vm612_vm15 = vcmp.ne.s32.totalorder %v973_v8, 0  ;;  %vm613_vm13 = vcmp.ne.s32.totalorder %v975_v9, 0 }
 0x1c5   : > { %v436_v13 = vpop.permute.xlu1 %435  ;;  %v641_v24 = vrot.slane %v622_v22, %v921_v44  ;;  %v650_v49 = vrot.slane %v624_v26, %v930_v47  ;;  %v628_v55 = vsel %vm612_vm15, 1, %v837_v0 }
 0x1c6   : > { %vm458_vm14 = vcmp.ne.s32.totalorder %v1029_v43, %v436_v13  ;;  %v670_v1 = vrot.slane %v628_v55, %v963_v2 }
 0x1c7   : > { %v474_v37 = vsel %vm458_vm14, 1, %v837_v0  ;;  %vm609_vm14 = vcmp.ne.s32.totalorder %v935_v50, 0  ;;  %v646_v41 = vsel %vm263_vm2, %v645_v23, %v641_v24 }
 0x1c8   : > { %517 = vperm.xlu0 %827, %v474_v37   ;;  %520 = vperm.xlu1 %828, %v475_v14   ;;  %v625_v27 = vsel %vm609_vm14, 1, %v837_v0  ;;  %v651_v33 = vsel %vm270_vm3, %v650_v49, %v646_v41  ;;  %vm614_vm14 = vcmp.ne.s32.totalorder %v991_v18, 0 }
 0x1c9   : > { %v444_v16 = vpop.permute.xlu1 %443  ;;  %v655_v32 = vrot.slane %v625_v27, %v927_v46  ;;  %v630_v9 = vsel %vm614_vm14, 1, %v837_v0 }
 0x1ca   : > { %vm460_vm0 = vcmp.ne.s32.totalorder %v1045_v59, %v444_v16  ;;  %v680_v14 = vrot.slane %v630_v9, %v980_v11 }
 0x1cb   : > { %v476_v17 = vsel %vm460_vm0, 1, %v837_v0  ;;  %vm610_vm0 = vcmp.ne.s32.totalorder %v955_v61, 0  ;;  %v656_v61 = vsel %vm277_vm4, %v655_v32, %v651_v33 }
 0x1cc   : > { %523 = vperm.xlu0 %827, %v476_v17   ;;  %v626_v42 = vsel %vm610_vm0, 1, %v837_v0  ;;  %vm615_vm0 = vcmp.ne.s32.totalorder %v993_v19, 0 }
 0x1cd   : > { %v660_v34 = vrot.slane %v626_v42, %v938_v51  ;;  %v631_v19 = vsel %vm615_vm0, 1, %v837_v0 }
 0x1ce   : > { %v685_v22 = vrot.slane %v631_v19, %v987_v15 }
 0x1cf   : > { %v661_v8 = vsel %vm284_vm5, %v660_v34, %v656_v61 }
 0x1d0   : > { %v666_v7 = vsel %vm291_vm6, %v665_v56, %v661_v8 }
 0x22b   : > { %v482_v30 = vpop.permute.xlu1 %481  ;;  %v479_v50 = vpop.permute.xlu0 %478 }
 0x22c   : > { %v532_v48 = vrot.slane %v482_v30, %v924_v45  ;;  %v528_v54 = vrot.slane %v479_v50, %v921_v44  ;;  %v629_v45 = vsel %vm613_vm13, 1, %v837_v0 }
 0x22d   : > { %v675_v10 = vrot.slane %v629_v45, %v969_v5 }
 0x22e   : > { %v533_v44 = vsel %vm263_vm2, %v532_v48, %v528_v54  ;;  %vm617_vm2 = vcmp.ne.s32.totalorder %v1011_v29, 0 }
 0x22f   : > { %v485_v35 = vpop.permute.xlu1 %484  ;;  %v633_v27 = vsel %vm617_vm2, 1, %v837_v0 }
 0x230   : > { %v537_v62 = vrot.slane %v485_v35, %v930_v47 }
 0x232   : > { %v538_v47 = vsel %vm270_vm3, %v537_v62, %v533_v44  ;;  %vm618_vm3 = vcmp.ne.s32.totalorder %v1027_v40, 0 }
 0x233   : > { %v491_v60 = vpop.permute.xlu1 %490  ;;  %v488_v63 = vpop.permute.xlu0 %487  ;;  %v634_v49 = vsel %vm618_vm3, 1, %v837_v0 }
 0x234   : > { %v542_v3 = vrot.slane %v488_v63, %v927_v46  ;;  %v547_v18 = vrot.slane %v491_v60, %v938_v51  ;;  %v671_v46 = vsel %vm298_vm7, %v670_v1, %v666_v7  ;;  %v632_v51 = vsel %vm616_vm1, 1, %v837_v0 }
 0x235   : > { %v676_v20 = vsel %vm305_vm8, %v675_v10, %v671_v46  ;;  %v690_v26 = vrot.slane %v632_v51, %v998_v21  ;;  %v700_v50 = vrot.slane %v634_v49, %v1016_v31  ;;  %v372_v63 = vstv %s808_s24 }
 0x236   : > { %v543_v6 = vsel %vm277_vm4, %v542_v3, %v538_v47  ;;  %vm619_vm4 = vcmp.ne.s32.totalorder %v1029_v43, 0  ;;  %v373_v47 = vadd.s32 %v372_v63, %v907_v36 }
 0x237   : > { %v497_v12 = vpop.permute.xlu1 %496  ;;  %v494_v13 = vpop.permute.xlu0 %493  ;;  %v548_v16 = vsel %vm284_vm5, %v547_v18, %v543_v6  ;;  %vm620_vm5 = vcmp.ne.s32.totalorder %v1043_v58, 0  ;;  %v635_v34 = vsel %vm619_vm4, 1, %v837_v0 }
 0x238   : > { %v552_v37 = vrot.slane %v494_v13, %v950_v57  ;;  %v557_v28 = vrot.slane %v497_v12, %v963_v2  ;;  %v681_v57 = vsel %vm312_vm9, %v680_v14, %v676_v20  ;;  %v636_v39 = vsel %vm620_vm5, 1, %v837_v0  ;;  %v727_v12 = vld [vmem:[%s186_s27] sm:$0x1] }
 0x239   : > { %v686_v30 = vsel %vm319_vm10, %v685_v22, %v681_v57  ;;  %v710_v56 = vrot.slane %v636_v39, %v1034_v52  ;;  %vm377_vm15 = vcmp.eq.s32.totalorder %v373_v47, 0  ;;  %vm719_vm0 = vcmp.lt.s32.totalorder %v373_v47, 300 }
 0x23a   : > { %v553_v17 = vsel %vm291_vm6, %v552_v37, %v548_v16  ;;  %v691_v33 = vsel %vm326_vm11, %v690_v26, %v686_v30  ;;  %vm621_vm6 = vcmp.ne.s32.totalorder %v1045_v59, 0  ;;  %vm724_vm5 = vcmask 1040384  }
 0x23b   : > { %v503_v23 = vpop.permute.xlu1 %502  ;;  %v500_v24 = vpop.permute.xlu0 %499  ;;  %v558_v41 = vsel %vm298_vm7, %v557_v28, %v553_v17  ;;  %vm1203_vm7 = vcmask 851712   ;;  %v637_v59 = vsel %vm621_vm6, 1, %v837_v0  ;;  %vm725_vm6 = vsmask.f32 0 }
 0x23c   : > { %v562_v2 = vrot.slane %v500_v24, %v969_v5  ;;  %v567_v29 = vrot.slane %v503_v23, %v980_v11  ;;  %v695_v5 = vrot.slane %v633_v27, %v1005_v25  ;;  %v715_v3 = vrot.slane %v637_v59, %v1037_v53 }
 0x23e   : > { %v563_v40 = vsel %vm305_vm8, %v562_v2, %v558_v41  ;;  %v696_v58 = vsel %vm333_vm12, %v695_v5, %v691_v33  ;;  %vm1204_vm8 = vcmask 917312  }
 0x23f   : > { %v509_v32 = vpop.permute.xlu1 %508  ;;  %v506_v42 = vpop.permute.xlu0 %505  ;;  %v568_v35 = vsel %vm312_vm9, %v567_v29, %v563_v40  ;;  %v701_v62 = vsel %vm1203_vm7, %v700_v50, %v696_v58  ;;  %vm1205_vm9 = vmmov %vm1203_vm7 }
 0x240   : > { %v572_v11 = vrot.slane %v506_v42, %v987_v15  ;;  %v577_v43 = vrot.slane %v509_v32, %v998_v21  ;;  %v705_v15 = vrot.slane %v635_v34, %v1024_v38 }
 0x242   : > { %v573_v61 = vsel %vm319_vm10, %v572_v11, %v568_v35  ;;  %v706_v44 = vsel %vm1204_vm8, %v705_v15, %v701_v62  ;;  %vm1206_vm10 = vcmask 982912  }
 0x243   : > { %v515_v48 = vpop.permute.xlu1 %514  ;;  %v512_v54 = vpop.permute.xlu0 %511  ;;  %v578_v8 = vsel %vm326_vm11, %v577_v43, %v573_v61  ;;  %v711_v0 = vsel %vm1206_vm10, %v710_v56, %v706_v44  ;;  %vm1207_vm11 = vmmov %vm1204_vm8 }
 0x244   : > { %v582_v55 = vrot.slane %v512_v54, %v1005_v25  ;;  %v587_v21 = vrot.slane %v515_v48, %v1016_v31  ;;  %vm1209_vm13 = vmmov %vm1206_vm10 }
 0x245   : > { %vm726_vm8 = vmand %vm724_vm5, %vm725_vm6 }
 0x246   : > { %v583_v60 = vsel %vm333_vm12, %v582_v55, %v578_v8  ;;  %vm1208_vm12 = vcmask 1048512  }
 0x247   : > { %v521_v1 = vpop.permute.xlu1 %520  ;;  %v518_v45 = vpop.permute.xlu0 %517  ;;  %v588_v9 = vsel %vm1205_vm9, %v587_v21, %v583_v60  ;;  %v716_v10 = vsel %vm1208_vm12, %v715_v3, %v711_v0  ;;  %vm1210_vm14 = vmmov %vm1208_vm12 }
 0x248   : > { %v592_v25 = vrot.slane %v518_v45, %v1024_v38  ;;  %v597_v31 = vrot.slane %v521_v1, %v1034_v52  ;;  %vm717_vm2 = vcmp.ne.s32.totalorder %v716_v10, 0 }
 0x24a   : > { %v593_v18 = vsel %vm1207_vm11, %v592_v25, %v588_v9 }
 0x24b   : > { %v524_v6 = vpop.permute.xlu0 %523  ;;  %v598_v38 = vsel %vm1209_vm13, %v597_v31, %v593_v18 }
 0x24c   : > { %v602_v7 = vrot.slane %v524_v6, %v1037_v53 }
 0x24e   : > { %v603_v52 = vsel %vm1210_vm14, %v602_v7, %v598_v38 }
 0x24f   : > { %vm604_vm1 = vcmp.ne.s32.totalorder %v603_v52, 0 }
 0x250   : > { %vm605_vm3 = vmor %vm377_vm15, %vm604_vm1 }
 0x251   : > { %vm718_vm4 = vmand %vm605_vm3, %vm717_vm2 }
 0x252   : > { %vm720_vm7 = vmand %vm718_vm4, %vm719_vm0 }
 0x253   : > { %v721_v36 = vsel %vm720_vm7, %v1054_v4, 4294967295 }
 0x254   : > { %v722_v53 = vpack.c.b16 %v721_v36, %v721_v36 }
 0x256   : > { %v723_v13 = vpack.c.b8 %v722_v53, %v722_v53 }
 0x258   : > { %v728_v46 = vsel %vm726_vm8, %v723_v13, %v727_v12 }
 0x259   : > { %729 = vst [vmem:[%s186_s27] sm:$0x1] %v728_v46 }
 0x25a PF: > { %s12_s9 = sadd.s32 1, %s835_s9  }
 0x25b   : > { %p9_p7 = scmp.ge.s32.totalorder %s12_s9, 5  }
 0x25d   :  { %11 = sbr.rel (!%p9_p7) target bundleno = 1 (0x1), region = 61 }

</bundles_post_ra>
